<compile_context>
chip_gen: v7x
topology: tpu7x:2x2x1
jax: 0.10.0
libtpu: 0.0.40
codegen_flags: <defaults>
</compile_context>

<pallas_src>
import jax
import jax.numpy as jnp
from jax.experimental import pallas as pl
from jax.experimental.pallas import tpu as pltpu


def _gcn_conv_kernel(adj_ref, x_ref, w_ref, out_ref):
    # support = x @ W -- kept in vregs, f32 accumulation on the MXU.
    support = jnp.dot(x_ref[...], w_ref[...], preferred_element_type=jnp.float32)
    # out[row_tile] = adj[row_tile, :] @ support   (bf16 inputs, f32 accumulate)
    out_ref[...] = jnp.dot(
        adj_ref[...],
        support.astype(adj_ref.dtype),
        preferred_element_type=jnp.float32,
    ).astype(out_ref.dtype)


def _round_up(v, m):
    return (v + m - 1) // m * m


def gcn_conv(
    x,
    adj,
    weight,
    *,
    compute_dtype=jnp.bfloat16,
    max_block_rows=512,
    adj_tile_bytes=4 * 1024 * 1024,
):
    """GCNConv forward: adj @ (x @ weight).

    x:      (N, C_in)
    adj:    (N, N) dense normalized adjacency ("edge_index" in the module)
    weight: (C_in, C_out)
    returns (N, C_out) in x.dtype
    """
    n, c_in = x.shape
    c_out = weight.shape[1]
    assert adj.shape == (n, n)

    itemsize = jnp.dtype(compute_dtype).itemsize
    # Rows per adj tile, bounded by a per-buffer VMEM budget (double-buffered
    # by the pipeline) so it fits the scoped-VMEM default on v5e/v6e/v7x.
    rows_budget = max(8, adj_tile_bytes // max(1, n * itemsize))
    tm = min(max_block_rows, rows_budget, _round_up(n, 8))
    tm = max(8, (tm // 8) * 8)
    n_pad = _round_up(n, tm)

    # Narrow dtype for HBM traffic / MXU throughput; f32 accumulation in-kernel.
    adj_c = adj.astype(compute_dtype)
    if n_pad != n:
        adj_c = jnp.pad(adj_c, ((0, n_pad - n), (0, 0)))
    x_c = x.astype(compute_dtype)
    w_c = weight.astype(compute_dtype)

    out = pl.pallas_call(
        _gcn_conv_kernel,
        out_shape=jax.ShapeDtypeStruct((n_pad, c_out), jnp.float32),
        grid_spec=pl.GridSpec(
            grid=(n_pad // tm,),
            in_specs=[
                # adj row tile: streams through, auto double-buffered.
                pl.BlockSpec((tm, n), lambda i: (i, 0)),
                # x and W: full extent, same block every step -> stay resident.
                pl.BlockSpec((n, c_in), lambda i: (0, 0)),
                pl.BlockSpec((c_in, c_out), lambda i: (0, 0)),
            ],
            out_specs=pl.BlockSpec((tm, c_out), lambda i: (i, 0)),
        ),
        compiler_params=pltpu.CompilerParams(
            # Row tiles are independent -> megacore / 2-TC split on v7x.
            dimension_semantics=("parallel",),
        ),
    )(adj_c, x_c, w_c)

    return out[:n].astype(x.dtype)


def xavier_uniform(key, shape, dtype=jnp.float32):
    fan_in, fan_out = shape
    limit = jnp.sqrt(6.0 / (fan_in + fan_out))
    return jax.random.uniform(key, shape, dtype, minval=-limit, maxval=limit)


if __name__ == "__main__":
    # Small shapes consistent with the module: N nodes, in/out channels.
    N, C_IN, C_OUT = 256, 32, 16

    key = jax.random.PRNGKey(0)
    k_x, k_adj, k_w = jax.random.split(key, 3)

    x = jax.random.normal(k_x, (N, C_IN), dtype=jnp.float32)

    # Deterministic dense "edge_index" (row-normalized adjacency-like matrix).
    raw = jax.random.uniform(k_adj, (N, N), dtype=jnp.float32)
    adj = (raw > 0.8).astype(jnp.float32) + jnp.eye(N, dtype=jnp.float32)
    adj = adj / jnp.sum(adj, axis=1, keepdims=True)

    # nn.init.xavier_uniform_ on (C_IN, C_OUT) weight, deterministic.
    weight = xavier_uniform(k_w, (C_IN, C_OUT))

    # bias=False and batch_norm=False are the module defaults -> not applied.
    # TODO(synk): bias add and BatchNorm1d (self.bn) paths not translated;
    #             both are disabled by default in the module.

    # max_block_rows=128 -> 2 grid steps at N=256, exercising the row tiling.
    out = gcn_conv(x, adj, weight, max_block_rows=128)
    jax.block_until_ready(out)

    # Reference 1: identical bf16 / f32-accumulate math as the kernel.
    xb = x.astype(jnp.bfloat16)
    ab = adj.astype(jnp.bfloat16)
    wb = weight.astype(jnp.bfloat16)
    ref_support = jnp.dot(xb, wb, preferred_element_type=jnp.float32).astype(
        jnp.bfloat16
    )
    ref_bf16 = jnp.dot(ab, ref_support, preferred_element_type=jnp.float32)

    # Reference 2: full-f32 math of the PyTorch module (loose tolerance).
    ref_f32 = adj @ (x @ weight)

    assert out.shape == (N, C_OUT)
    assert jnp.allclose(out, ref_bf16, atol=1e-2, rtol=1e-2), float(
        jnp.max(jnp.abs(out - ref_bf16))
    )
    assert jnp.allclose(out, ref_f32, atol=5e-2, rtol=5e-2), float(
        jnp.max(jnp.abs(out - ref_f32))
    )

    print("KERNEL_OK")
</pallas_src>

<mosaic_0001>
module attributes {stable_mosaic.version = 11 : i64} {
  func.func @_gcn_conv_kernel(%arg0: i32, %arg1: memref<128x256xbf16, #tpu.memory_space<vmem>>, %arg2: memref<256x32xbf16, #tpu.memory_space<vmem>>, %arg3: memref<32x16xbf16, #tpu.memory_space<vmem>>, %arg4: memref<128x16xf32, #tpu.memory_space<vmem>>) attributes {dimension_semantics = [#tpu.dimension_semantics<parallel>], iteration_bounds = array<i64: 2>, scalar_prefetch = 0 : i64, scratch_operands = 0 : i64, tpu.core_type = #tpu.core_type<tc>, window_params = [{transform_indices = @transform_0, window_bounds = array<i64: 128, 256>}, {pipeline_mode = #tpu.pipeline_mode<synchronous>, transform_indices = @transform_1, window_bounds = array<i64: 256, 32>}, {pipeline_mode = #tpu.pipeline_mode<synchronous>, transform_indices = @transform_2, window_bounds = array<i64: 32, 16>}, {transform_indices = @transform_3, window_bounds = array<i64: 128, 16>}]} {
    %c0 = arith.constant 0 : index
    %c0_0 = arith.constant 0 : index
    %0 = vector.load %arg2[%c0, %c0_0] : memref<256x32xbf16, #tpu.memory_space<vmem>>, vector<256x32xbf16>
    %c0_1 = arith.constant 0 : index
    %c0_2 = arith.constant 0 : index
    %1 = vector.load %arg3[%c0_1, %c0_2] : memref<32x16xbf16, #tpu.memory_space<vmem>>, vector<32x16xbf16>
    %cst = arith.constant dense<0.000000e+00> : vector<256x16xf32>
    %2 = tpu.matmul %0, %1, %cst {dimension_numbers = #tpu.dot_dimension_numbers<[1], [0], [0], [1], [0, 0, 1, 1], [], []>} : vector<256x32xbf16>, vector<32x16xbf16>, vector<256x16xf32> -> vector<256x16xf32>
    %c0_3 = arith.constant 0 : index
    %c0_4 = arith.constant 0 : index
    %3 = vector.load %arg1[%c0_3, %c0_4] : memref<128x256xbf16, #tpu.memory_space<vmem>>, vector<128x256xbf16>
    %4 = arith.truncf %2 : vector<256x16xf32> to vector<256x16xbf16>
    %cst_5 = arith.constant dense<0.000000e+00> : vector<128x16xf32>
    %5 = tpu.matmul %3, %4, %cst_5 {dimension_numbers = #tpu.dot_dimension_numbers<[1], [0], [0], [1], [0, 0, 1, 1], [], []>} : vector<128x256xbf16>, vector<256x16xbf16>, vector<128x16xf32> -> vector<128x16xf32>
    %c0_6 = arith.constant 0 : index
    %c0_7 = arith.constant 0 : index
    %6 = vector.load %arg4[%c0_6, %c0_7] : memref<128x16xf32, #tpu.memory_space<vmem>>, vector<128x16xf32>
    tpu.vector_store %arg4[%c0_6, %c0_7], %5 {strides = array<i32>} : memref<128x16xf32, #tpu.memory_space<vmem>>, vector<128x16xf32>,
    return
  }
  func.func @transform_0(%arg0: i32) -> (i32, i32) {
    %c0_i32 = arith.constant 0 : i32
    %c0_i32_0 = arith.constant 0 : i32
    return %arg0, %c0_i32 : i32, i32
  }
  func.func @transform_1(%arg0: i32) -> (i32, i32) {
    %c0_i32 = arith.constant 0 : i32
    %c0_i32_0 = arith.constant 0 : i32
    %c0_i32_1 = arith.constant 0 : i32
    return %c0_i32, %c0_i32_0 : i32, i32
  }
  func.func @transform_2(%arg0: i32) -> (i32, i32) {
    %c0_i32 = arith.constant 0 : i32
    %c0_i32_0 = arith.constant 0 : i32
    %c0_i32_1 = arith.constant 0 : i32
    return %c0_i32, %c0_i32_0 : i32, i32
  }
  func.func @transform_3(%arg0: i32) -> (i32, i32) {
    %c0_i32 = arith.constant 0 : i32
    %c0_i32_0 = arith.constant 0 : i32
    return %arg0, %c0_i32 : i32, i32
  }
}

</mosaic_0001>

<bundles_post_ra>
// kernel: tpu_custom_call.1
= control target key start
LH: loop header
LB: loop body
LE: loop exit
PB: predicated region body
PF: predicated region fallthrough
CT: control target
= control target key end

     0   :  { %8 = vsyncpa [#allocation3], 0  ;;  %s1427_s0 = inlined_call_operand.hbm [shape: bf16[256,256], index: 0, kind: input, shape index: {}]   ;;  %s1428_s1 = inlined_call_operand.vmem [shape: bf16[256,32], index: 1, kind: input, shape index: {}]   ;;  %s1429_s2 = inlined_call_operand.vmem [shape: bf16[32,16], index: 2, kind: input, shape index: {}]   ;;  %s1430_s3 = inlined_call_operand.vmem [shape: f32[256,16], index: 3, kind: output, shape index: {}]  }
   0x1   :  { %10 = vsyncpa [#allocation3 + $0x1], 0  ;;  %s1198_s12 = smov 0   ;;  %s1200_s13 = smov 0  }
   0x2   :  { %s1202_s14 = smov 0   ;;  %s1204_s15 = smov 0  }
   0x3 LB: > { %s826_s16 = sadd.s32 4294967295, %s1173_s15   ;;  %s1218_s17 = sadd.s32 1, %s1173_s15   ;;  %s1173_s15 = sphi %s1204_s15, %s1437_s15   ;;  %s1169_s14 = sphi %s1202_s14, %s1436_s14   ;;  %s1165_s13 = sphi %s1200_s13, %s1435_s13   ;;  %s1161_s12 = sphi %s1198_s12, %s1434_s12  }
   0x4   : > { %s20_s18 = ssub.s32 %s1173_s15, %s1218_s17  ;;  %s23_s19 = sadd.s32 1, %s1169_s14 }
   0x5   : > { %p21_p0 = scmp.eq.s32.totalorder %s20_s18, 0  ;;  %p30_p1 = scmp.ne.s32.totalorder %s1169_s14, %s1165_s13 }
   0x6   : > { %p31_p2 = scmp.eq.s32.totalorder %s1173_s15, 0  ;;  %p36_p3 = scmp.ne.s32.totalorder %s1165_s13, %s1161_s12 }
   0x7   : > { %s1228_s20 = scalar_select %p21_p0, %s1169_s14, %s23_s19  }
   0x8   : > { %p32_p4 = por %p31_p2, %p30_p1  ;;  %p37_p5 = scmp.eq.s32.totalorder %s826_s16, 0 }
   0x9   : > { %p1032_p6 = scmp.lt.s32.totalorder %s1173_s15, 2  ;;  %s134_s22 = sand.u32 1, %s1169_s14  }
   0xa   : > { %p1233_p7 = por %p37_p5, %p36_p3  ;;  %s830_s23 = sshll.u32 %s134_s22, 7 }
   0xb   : > { %s891_s24 = sshll.u32 %s1173_s15, 11  ;;  %s138_s28 = scalar_lea.vmem [#allocation2], %s830_s23 }
   0xc   : > { %s1242_s27 = scalar_lea.hbm %s1427_s0, %s891_s24  ;;  %s146_s29 = sshll.u32 %s138_s28, 4  ;;  %s1244_s29 = int_to_ptr.vmem [resolvable:$true] %s146_s29 }
   0xd   : > { %p1246_p8 = pnand %p1032_p6, %p32_p4  ;;  %s1251_s4 = scalar_lea.sflag [#allocation3], %s134_s22 }
   0xe   : > { %s1109_s5 = scalar_lea.hbm %s1242_s27, 2048  ;;  %s1114_s8 = scalar_lea.hbm %s1427_s0, 4096 }
   0xf   : > { %p1110_p10 = scmp.ne.s32.totalorder %s1242_s27, %s1109_s5  ;;  %p1111_p11 = pneg %p1246_p8 }
  0x10   : > { %p1115_p0 = scmp.lt.u32.totalorder %s1242_s27, %s1427_s0  ;;  %p1116_p1 = scmp.lt.u32.totalorder %s1114_s8, %s1109_s5 }
  0x11   : > { %p1112_p12 = pnand %p1111_p11, %p1110_p10  ;;  %p1118_p3 = scmp.lt.u32.totalorder %s1109_s5, %s1242_s27 }
  0x12   : > { %p1117_p2 = por %p1116_p1, %p1115_p0 }
  0x13   : > { %p1113_p13 = pneg %p1112_p12 }
  0x14   : > { %p1119_p4 = por %p1118_p3, %p1117_p2 }
  0x16   : > { %p1120_p5 = pnand %p1119_p4, %p1113_p13 }
  0x18   : > { %1123 = shalt.err (!%p1120_p5)
}
  0x19   : > { %s1124_s11 = scalar_lea.vmem %s1244_s29, 2048  ;;  %s1175_s12 = smov [#allocation2]  }
  0x1a   : > { %p1125_p6 = scmp.ne.s32.totalorder %s1244_s29, %s1124_s11  ;;  %s1129_s18 = sshll.u32 %s1175_s12, 4  ;;  %s1130_s18 = int_to_ptr.vmem [resolvable:$false] %s1129_s18 }
  0x1b   : > { %s1131_s19 = scalar_lea.vmem %s1130_s18, 4096  ;;  %p1132_p9 = scmp.lt.s32.totalorder %s1244_s29, %s1130_s18 }
  0x1c   : > { %p1127_p10 = pnand %p1125_p6, %p1111_p11  ;;  %p1133_p0 = scmp.lt.s32.totalorder %s1131_s19, %s1124_s11 }
  0x1e   : > { %p1128_p12 = pneg %p1127_p10  ;;  %p1134_p1 = por %p1133_p0, %p1132_p9 }
  0x20   : > { %p1135_p2 = pnand %p1134_p1, %p1128_p12 }
  0x22   : > { %1138 = shalt.err (!%p1135_p2)
}
  0x23   : > { %s1176_s22 = smov 128   ;;  %s1177_s23 = smov 8  }
  0x24   : > { %1031 = dma.hbm_to_vmem [thread:$0]  (!%p1246_p8), %s1242_s27, 2048, %s1244_s29, %s1251_s4, %s1176_s22, %s1176_s22, %s1177_s23  }
  0x25   : > { %p154_p11 = scmp.lt.s32.totalorder %s1173_s15, 3  ;;  %p1433_p13 = scmp.ge.s32.totalorder %s1173_s15, 1 }
  0x27   : > { %p155_p3 = pnand %p1433_p13, %p154_p11 }
  0x28   : > { %s160_s24 = sand.u32 (!%p155_p3), 1, %s1165_s13  }
  0x29   : > { %158 = sbr.rel (%p155_p3) target bundleno = 605 (0x25d), region = 32  ;;  %s835_s25 = sshll.u32 (!%p155_p3), %s160_s24, 7 }
  0x2a   : > { %s161_s26 = scalar_lea.sflag (!%p155_p3), [#allocation3], %s160_s24  ;;  %s1283_s28 = scalar_lea.vmem (!%p155_p3), [#allocation2], %s835_s25 }
  0x30   : > { %1156 = dma.done.wait (%p1233_p7), %s161_s26, 2048  }
  0x31   : > { %1158 = vsyncadd (%p1233_p7), %s161_s26, 4294965248  ;;  %v1067_v0 = vld [vmem:[%s1429_s2] sm:$0xff]   ;;  %v1068_v1 = vld [vmem:[%s1429_s2 + $0x8] sm:$0xff]   ;;  %vm323_vm0 = vcmask 261120   ;;  %s836_s23 = sshll.u32 %s826_s16, 4  ;;  %vm742_vm1 = vcmask 130048  }
  0x32   : > { %974 = vmatprep.subr.bf16.mxu0 %v1067_v0  ;;  %v1069_v2 = vld [vmem:[%s1428_s1] sm:$0xff]   ;;  %v1070_v3 = vld [vmem:[%s1428_s1 + $0x8] sm:$0xff]   ;;  %v1071_v4 = vld [vmem:[%s1428_s1 + $0x10] sm:$0xff]   ;;  %p189_p7 = scmp.lt.s32.totalorder %s836_s23, 31 }
  0x33   : > { %975 = vmatpush3.bf16.msra.mxu0 %v1067_v0  ;;  %978 = vmatprep.mubr.msk.bf16.mxu0 %vm323_vm0, %v1069_v2  ;;  %v1072_v5 = vld [vmem:[%s1428_s1 + $0x18] sm:$0xff]   ;;  %v1073_v6 = vld [vmem:[%s1428_s1 + $0x20] sm:$0xff]   ;;  %v1074_v7 = vld [vmem:[%s1428_s1 + $0x28] sm:$0xff]  }
  0x34   : > { %976 = vmatprep.subr.bf16.mxu0 %v1068_v1  ;;  %v1075_v8 = vld [vmem:[%s1428_s1 + $0x30] sm:$0xff]   ;;  %v1076_v9 = vld [vmem:[%s1428_s1 + $0x38] sm:$0xff]   ;;  %v1077_v10 = vld [vmem:[%s1428_s1 + $0x40] sm:$0xff]   ;;  %s1439_s23 = smov (!%p189_p7, %s836_s23), 31 }
  0x35   : > { %v1078_v11 = vld [vmem:[%s1428_s1 + $0x48] sm:$0xff]   ;;  %v1079_v12 = vld [vmem:[%s1428_s1 + $0x50] sm:$0xff]   ;;  %v1080_v13 = vld [vmem:[%s1428_s1 + $0x58] sm:$0xff]   ;;  %s837_s24 = sshll.u32 %s1439_s23, 3 }
  0x36   : > { %v1081_v14 = vld [vmem:[%s1428_s1 + $0x60] sm:$0xff]   ;;  %v1082_v15 = vld [vmem:[%s1428_s1 + $0x68] sm:$0xff]   ;;  %v1083_v16 = vld [vmem:[%s1428_s1 + $0x70] sm:$0xff]   ;;  %s1380_s5 = scalar_lea.vmem %s1430_s3, %s837_s24 }
  0x37   : > { %977 = vmatpush3.bf16.msra.mxu0 %v1068_v1  ;;  %v1084_v17 = vld [vmem:[%s1428_s1 + $0x78] sm:$0xff]   ;;  %v1105_v19 = vld [vmem:[%s1283_s28 + $0x4] ss:$8 sps:$4 sm:$0xff]  }
  0x38   : > { %v1087_v18 = vld [vmem:[%s1283_s28 + $0x14] ss:$8 sps:$4 sm:$0xff]  }
  0x39   : > { %685 = vmatprep.mubr.bf16.mxu1 %v1087_v18 }
  0x3a   : > { %979 = vmatmul.mubr.msk.bf16.vlgmr.msra.gmra.mrb[0].mxu0 %vm323_vm0, %v1070_v3 }
  0x3b   : > { %982 = vmatprep.mubr.msk.bf16.mxu0 %vm323_vm0, %v1071_v4  ;;  %v1085_v4 = vld [vmem:[%s1283_s28 + $0x10] ss:$8 sps:$4 sm:$0xff]  }
  0x42   : > { %983 = vmatmul.mubr.msk.bf16.gmra.mrb[4].mxu0 %vm323_vm0, %v1072_v5  ;;  %v1103_v5 = vld [vmem:[%s1283_s28] ss:$8 sps:$4 sm:$0xff]  }
  0x43   : > { %986 = vmatprep.mubr.msk.bf16.mxu0 %vm323_vm0, %v1073_v6  ;;  %v1088_v6 = vld [vmem:[%s1283_s28 + $0x24] ss:$8 sps:$4 sm:$0xff]  }
  0x4a   : > { %987 = vmatmul.mubr.msk.bf16.gmra.mrb[8].mxu0 %vm323_vm0, %v1074_v7  ;;  %v1090_v7 = vld [vmem:[%s1283_s28 + $0x20] ss:$8 sps:$4 sm:$0xff]  }
  0x4b   : > { %990 = vmatprep.mubr.msk.bf16.mxu0 %vm323_vm0, %v1075_v8  ;;  %v1091_v8 = vld [vmem:[%s1283_s28 + $0x34] ss:$8 sps:$4 sm:$0xff]  }
  0x52   : > { %991 = vmatmul.mubr.msk.bf16.gmra.mrb[12].mxu0 %vm323_vm0, %v1076_v9  ;;  %v1093_v9 = vld [vmem:[%s1283_s28 + $0x30] ss:$8 sps:$4 sm:$0xff]  }
  0x53   : > { %994 = vmatprep.mubr.msk.bf16.mxu0 %vm323_vm0, %v1077_v10  ;;  %v1094_v10 = vld [vmem:[%s1283_s28 + $0x44] ss:$8 sps:$4 sm:$0xff]  }
  0x5a   : > { %995 = vmatmul.mubr.msk.bf16.gmra.mrb[16].mxu0 %vm323_vm0, %v1078_v11  ;;  %v1096_v11 = vld [vmem:[%s1283_s28 + $0x40] ss:$8 sps:$4 sm:$0xff]  }
  0x5b   : > { %998 = vmatprep.mubr.msk.bf16.mxu0 %vm323_vm0, %v1079_v12  ;;  %v1097_v12 = vld [vmem:[%s1283_s28 + $0x54] ss:$8 sps:$4 sm:$0xff]  }
  0x62   : > { %999 = vmatmul.mubr.msk.bf16.gmra.mrb[20].mxu0 %vm323_vm0, %v1080_v13  ;;  %v1099_v13 = vld [vmem:[%s1283_s28 + $0x50] ss:$8 sps:$4 sm:$0xff]  }
  0x63   : > { %1002 = vmatprep.mubr.msk.bf16.mxu0 %vm323_vm0, %v1081_v14  ;;  %v1100_v14 = vld [vmem:[%s1283_s28 + $0x64] ss:$8 sps:$4 sm:$0xff]  }
  0x6a   : > { %1003 = vmatmul.mubr.msk.bf16.gmra.mrb[24].mxu0 %vm323_vm0, %v1082_v15  ;;  %v1102_v15 = vld [vmem:[%s1283_s28 + $0x60] ss:$8 sps:$4 sm:$0xff]  }
  0x6b   : > { %1006 = vmatprep.mubr.msk.bf16.mxu0 %vm323_vm0, %v1083_v16  ;;  %v1106_v16 = vld [vmem:[%s1283_s28 + $0x74] ss:$8 sps:$4 sm:$0xff]  }
  0x72   : > { %1007 = vmatmul.mubr.msk.bf16.gmra.mrb[28].mxu0 %vm323_vm0, %v1084_v17  ;;  %v1108_v17 = vld [vmem:[%s1283_s28 + $0x70] ss:$8 sps:$4 sm:$0xff]  }
  0x73   : > { %677 = vmatprep.mubr.bf16.mxu0 %v1105_v19 }
 0x10d   : > { %v980_v20 = vpop.f32.mrb[0].mxu0 }
 0x10e   : > { %v406_v21 = vpop.f32.mrb[1].mxu0 }
 0x10f   : > { %v981_v22 = vpop.f32.mrb[2].mxu0 }
 0x110   : > { %v550_v23 = vpack.c.bf16 %v981_v22, %v980_v20  ;;  %v409_v24 = vpop.f32.mrb[3].mxu0 }
 0x111   : > { %v549_v25 = vpack.c.bf16 %v409_v24, %v406_v21 }
 0x115   : > { %v984_v26 = vpop.f32.mrb[4].mxu0 }
 0x116   : > { %v422_v27 = vpop.f32.mrb[5].mxu0 }
 0x117   : > { %v985_v28 = vpop.f32.mrb[6].mxu0 }
 0x118   : > { %v552_v29 = vpack.c.bf16 %v985_v28, %v984_v26  ;;  %v425_v30 = vpop.f32.mrb[7].mxu0 }
 0x119   : > { %v551_v31 = vpack.c.bf16 %v425_v30, %v422_v27 }
 0x11d   : > { %v988_v32 = vpop.f32.mrb[8].mxu0 }
 0x11e   : > { %v438_v33 = vpop.f32.mrb[9].mxu0 }
 0x11f   : > { %v989_v34 = vpop.f32.mrb[10].mxu0 }
 0x120   : > { %v554_v35 = vpack.c.bf16 %v989_v34, %v988_v32  ;;  %v441_v36 = vpop.f32.mrb[11].mxu0 }
 0x121   : > { %v553_v37 = vpack.c.bf16 %v441_v36, %v438_v33 }
 0x125   : > { %v992_v38 = vpop.f32.mrb[12].mxu0 }
 0x126   : > { %v454_v39 = vpop.f32.mrb[13].mxu0 }
 0x127   : > { %v993_v40 = vpop.f32.mrb[14].mxu0 }
 0x128   : > { %v556_v41 = vpack.c.bf16 %v993_v40, %v992_v38  ;;  %v457_v42 = vpop.f32.mrb[15].mxu0 }
 0x129   : > { %v555_v43 = vpack.c.bf16 %v457_v42, %v454_v39 }
 0x12d   : > { %v996_v44 = vpop.f32.mrb[16].mxu0 }
 0x12e   : > { %v470_v45 = vpop.f32.mrb[17].mxu0 }
 0x12f   : > { %v997_v46 = vpop.f32.mrb[18].mxu0 }
 0x130   : > { %v558_v47 = vpack.c.bf16 %v997_v46, %v996_v44  ;;  %v473_v48 = vpop.f32.mrb[19].mxu0 }
 0x131   : > { %v557_v49 = vpack.c.bf16 %v473_v48, %v470_v45 }
 0x133   : > { %910 = vmatprep.subr.bf16.mxu0 %v557_v49  ;;  %1010 = vmatprep.subr.bf16.mxu1 %v557_v49 }
 0x134   : > { %911 = vmatpush3.bf16.msra.mxu0 %v549_v25  ;;  %1018 = vmatpush3.bf16.msra.mxu1 %v549_v25 }
 0x135   : > { %v1000_v50 = vpop.f32.mrb[20].mxu0  ;;  %912 = vmatprep.subr.bf16.mxu0 %v558_v47  ;;  %1011 = vmatprep.subr.bf16.mxu1 %v558_v47 }
 0x136   : > { %v486_v51 = vpop.f32.mrb[21].mxu0 }
 0x137   : > { %v1001_v52 = vpop.f32.mrb[22].mxu0 }
 0x138   : > { %v560_v53 = vpack.c.bf16 %v1001_v52, %v1000_v50  ;;  %v489_v54 = vpop.f32.mrb[23].mxu0  ;;  %913 = vmatpush3.bf16.msra.mxu0 %v550_v23  ;;  %1019 = vmatpush3.bf16.msra.mxu1 %v550_v23 }
 0x139   : > { %v559_v55 = vpack.c.bf16 %v489_v54, %v486_v51 }
 0x13b   : > { %914 = vmatprep.subr.bf16.mxu0 %v559_v55  ;;  %1012 = vmatprep.subr.bf16.mxu1 %v559_v55 }
 0x13c   : > { %915 = vmatpush3.bf16.msra.mxu0 %v551_v31  ;;  %1020 = vmatpush3.bf16.msra.mxu1 %v551_v31 }
 0x13d   : > { %v1004_v56 = vpop.f32.mrb[24].mxu0  ;;  %916 = vmatprep.subr.bf16.mxu0 %v560_v53  ;;  %1013 = vmatprep.subr.bf16.mxu1 %v560_v53 }
 0x13e   : > { %v502_v57 = vpop.f32.mrb[25].mxu0 }
 0x13f   : > { %v1005_v58 = vpop.f32.mrb[26].mxu0 }
 0x140   : > { %v562_v59 = vpack.c.bf16 %v1005_v58, %v1004_v56  ;;  %v505_v60 = vpop.f32.mrb[27].mxu0  ;;  %917 = vmatpush3.bf16.msra.mxu0 %v552_v29  ;;  %1021 = vmatpush3.bf16.msra.mxu1 %v552_v29 }
 0x141   : > { %v561_v61 = vpack.c.bf16 %v505_v60, %v502_v57 }
 0x143   : > { %918 = vmatprep.subr.bf16.mxu0 %v561_v61  ;;  %1014 = vmatprep.subr.bf16.mxu1 %v561_v61 }
 0x144   : > { %919 = vmatpush3.bf16.msra.mxu0 %v553_v37  ;;  %1022 = vmatpush3.bf16.msra.mxu1 %v553_v37 }
 0x145   : > { %v1008_v62 = vpop.f32.mrb[28].mxu0  ;;  %920 = vmatprep.subr.bf16.mxu0 %v562_v59  ;;  %1015 = vmatprep.subr.bf16.mxu1 %v562_v59 }
 0x146   : > { %v518_v63 = vpop.f32.mrb[29].mxu0 }
 0x147   : > { %v1009_v0 = vpop.f32.mrb[30].mxu0 }
 0x148   : > { %v564_v1 = vpack.c.bf16 %v1009_v0, %v1008_v62  ;;  %v521_v2 = vpop.f32.mrb[31].mxu0  ;;  %921 = vmatpush3.bf16.msra.mxu0 %v554_v35  ;;  %1023 = vmatpush3.bf16.msra.mxu1 %v554_v35 }
 0x149   : > { %v563_v3 = vpack.c.bf16 %v521_v2, %v518_v63 }
 0x14b   : > { %922 = vmatprep.subr.bf16.mxu0 %v563_v3  ;;  %1016 = vmatprep.subr.bf16.mxu1 %v563_v3 }
 0x14c   : > { %923 = vmatpush3.bf16.msra.mxu0 %v555_v43  ;;  %1024 = vmatpush3.bf16.msra.mxu1 %v555_v43 }
 0x14d   : > { %924 = vmatprep.subr.bf16.mxu0 %v564_v1  ;;  %1017 = vmatprep.subr.bf16.mxu1 %v564_v1 }
 0x150   : > { %925 = vmatpush3.bf16.msra.mxu0 %v556_v41  ;;  %1025 = vmatpush3.bf16.msra.mxu1 %v556_v41 }
 0x153   : > { %686 = vmatmul.mubr.bf16.vlgmr.msra.gmra.mrb[0].mxu1 %v1085_v4  ;;  %678 = vmatmul.mubr.bf16.vlgmr.msra.gmra.mrb[32].mxu0 %v1103_v5 }
 0x154   : > { %693 = vmatprep.mubr.bf16.mxu1 %v1088_v6 }
 0x15b   : > { %694 = vmatmul.mubr.bf16.gmra.mrb[4].mxu1 %v1090_v7 }
 0x15c   : > { %701 = vmatprep.mubr.bf16.mxu1 %v1091_v8 }
 0x163   : > { %702 = vmatmul.mubr.bf16.gmra.mrb[8].mxu1 %v1093_v9 }
 0x164   : > { %709 = vmatprep.mubr.bf16.mxu1 %v1094_v10 }
 0x16b   : > { %710 = vmatmul.mubr.bf16.gmra.mrb[12].mxu1 %v1096_v11 }
 0x16c   : > { %717 = vmatprep.mubr.bf16.mxu1 %v1097_v12 }
 0x173   : > { %718 = vmatmul.mubr.bf16.gmra.mrb[16].mxu1 %v1099_v13 }
 0x174   : > { %725 = vmatprep.mubr.bf16.mxu1 %v1100_v14 }
 0x17b   : > { %726 = vmatmul.mubr.bf16.gmra.mrb[20].mxu1 %v1102_v15 }
 0x17c   : > { %733 = vmatprep.mubr.bf16.mxu1 %v1106_v16 }
 0x183   : > { %734 = vmatmul.mubr.bf16.gmra.mrb[24].mxu1 %v1108_v17 }
 0x226   : > { %v932_v18 = vpop.f32.mrb[0].mxu1  ;;  %v926_v19 = vpop.f32.mrb[32].mxu0 }
 0x227   : > { %v933_v20 = vpop.f32.mrb[1].mxu1  ;;  %v927_v21 = vpop.f32.mrb[33].mxu0 }
 0x228   : > { %v934_v22 = vadd.f32 %v933_v20, %v932_v18  ;;  %v935_v23 = vpop.f32.mrb[2].mxu1  ;;  %v928_v24 = vadd.f32 %v927_v21, %v926_v19  ;;  %v929_v25 = vpop.f32.mrb[34].mxu0 }
 0x229   : > { %v936_v26 = vpop.f32.mrb[3].mxu1  ;;  %v930_v27 = vpop.f32.mrb[35].mxu0 }
 0x22a   : > { %745 = vst.msk [vmem:[%s1380_s5 + $0x10] sm:$0xff] %vm742_vm1, %v934_v22  ;;  %v937_v28 = vadd.f32 %v936_v26, %v935_v23  ;;  %743 = vst.msk [vmem:[%s1380_s5] sm:$0xff] %vm742_vm1, %v928_v24  ;;  %v931_v29 = vadd.f32 %v930_v27, %v929_v25 }
 0x22c   : > { %746 = vst.msk [vmem:[%s1380_s5 + $0x18] sm:$0xff] %vm742_vm1, %v937_v28  ;;  %744 = vst.msk [vmem:[%s1380_s5 + $0x8] sm:$0xff] %vm742_vm1, %v931_v29 }
 0x22e   : > { %v938_v30 = vpop.f32.mrb[4].mxu1 }
 0x22f   : > { %v939_v31 = vpop.f32.mrb[5].mxu1 }
 0x230   : > { %v940_v32 = vadd.f32 %v939_v31, %v938_v30  ;;  %v941_v33 = vpop.f32.mrb[6].mxu1 }
 0x231   : > { %v942_v34 = vpop.f32.mrb[7].mxu1 }
 0x232   : > { %747 = vst.msk [vmem:[%s1380_s5 + $0x20] sm:$0xff] %vm742_vm1, %v940_v32  ;;  %v943_v35 = vadd.f32 %v942_v34, %v941_v33 }
 0x234   : > { %748 = vst.msk [vmem:[%s1380_s5 + $0x28] sm:$0xff] %vm742_vm1, %v943_v35 }
 0x236   : > { %v944_v36 = vpop.f32.mrb[8].mxu1 }
 0x237   : > { %v945_v37 = vpop.f32.mrb[9].mxu1 }
 0x238   : > { %v946_v38 = vadd.f32 %v945_v37, %v944_v36  ;;  %v947_v39 = vpop.f32.mrb[10].mxu1 }
 0x239   : > { %v948_v40 = vpop.f32.mrb[11].mxu1 }
 0x23a   : > { %749 = vst.msk [vmem:[%s1380_s5 + $0x30] sm:$0xff] %vm742_vm1, %v946_v38  ;;  %v949_v41 = vadd.f32 %v948_v40, %v947_v39 }
 0x23c   : > { %750 = vst.msk [vmem:[%s1380_s5 + $0x38] sm:$0xff] %vm742_vm1, %v949_v41 }
 0x23e   : > { %v950_v42 = vpop.f32.mrb[12].mxu1 }
 0x23f   : > { %v951_v43 = vpop.f32.mrb[13].mxu1 }
 0x240   : > { %v952_v44 = vadd.f32 %v951_v43, %v950_v42  ;;  %v953_v45 = vpop.f32.mrb[14].mxu1 }
 0x241   : > { %v954_v46 = vpop.f32.mrb[15].mxu1 }
 0x242   : > { %751 = vst.msk [vmem:[%s1380_s5 + $0x40] sm:$0xff] %vm742_vm1, %v952_v44  ;;  %v955_v47 = vadd.f32 %v954_v46, %v953_v45 }
 0x244   : > { %752 = vst.msk [vmem:[%s1380_s5 + $0x48] sm:$0xff] %vm742_vm1, %v955_v47 }
 0x246   : > { %v956_v48 = vpop.f32.mrb[16].mxu1 }
 0x247   : > { %v957_v49 = vpop.f32.mrb[17].mxu1 }
 0x248   : > { %v958_v50 = vadd.f32 %v957_v49, %v956_v48  ;;  %v959_v51 = vpop.f32.mrb[18].mxu1 }
 0x249   : > { %v960_v52 = vpop.f32.mrb[19].mxu1 }
 0x24a   : > { %753 = vst.msk [vmem:[%s1380_s5 + $0x50] sm:$0xff] %vm742_vm1, %v958_v50  ;;  %v961_v53 = vadd.f32 %v960_v52, %v959_v51 }
 0x24c   : > { %754 = vst.msk [vmem:[%s1380_s5 + $0x58] sm:$0xff] %vm742_vm1, %v961_v53 }
 0x24e   : > { %v962_v54 = vpop.f32.mrb[20].mxu1 }
 0x24f   : > { %v963_v55 = vpop.f32.mrb[21].mxu1 }
 0x250   : > { %v964_v56 = vadd.f32 %v963_v55, %v962_v54  ;;  %v965_v57 = vpop.f32.mrb[22].mxu1 }
 0x251   : > { %v966_v58 = vpop.f32.mrb[23].mxu1 }
 0x252   : > { %755 = vst.msk [vmem:[%s1380_s5 + $0x60] sm:$0xff] %vm742_vm1, %v964_v56  ;;  %v967_v59 = vadd.f32 %v966_v58, %v965_v57 }
 0x254   : > { %756 = vst.msk [vmem:[%s1380_s5 + $0x68] sm:$0xff] %vm742_vm1, %v967_v59 }
 0x256   : > { %v968_v60 = vpop.f32.mrb[24].mxu1 }
 0x257   : > { %v969_v61 = vpop.f32.mrb[25].mxu1 }
 0x258   : > { %v970_v62 = vadd.f32 %v969_v61, %v968_v60  ;;  %v971_v63 = vpop.f32.mrb[26].mxu1 }
 0x259   : > { %v972_v0 = vpop.f32.mrb[27].mxu1 }
 0x25a   : > { %757 = vst.msk [vmem:[%s1380_s5 + $0x70] sm:$0xff] %vm742_vm1, %v970_v62  ;;  %v973_v1 = vadd.f32 %v972_v0, %v971_v63 }
 0x25c   : > { %758 = vst.msk [vmem:[%s1380_s5 + $0x78] sm:$0xff] %vm742_vm1, %v973_v1 }
 0x25d PF: > { %p13_p8 = scmp.ge.s32.totalorder %s1218_s17, 4   ;;  %s1434_s12 = smov %s1165_s13 }
 0x25e   : > { %s1435_s13 = smov %s1169_s14  ;;  %s1436_s14 = smov %s1228_s20 }
 0x25f   : > { %s1437_s15 = smov %s1218_s17  ;;  %15 = sbr.rel (!%p13_p8) target bundleno = 3 (0x3), region = 72 }
 0x266   :  { %781 = vsyncpa [#allocation3], 1 }
 0x267   :  { %783 = vsyncpa [#allocation3 + $0x1], 1 }

</bundles_post_ra>
